<compile_context>
chip_gen: v7x
topology: tpu7x:2x2x1
jax: 0.10.0
libtpu: 0.0.40
codegen_flags: <defaults>
</compile_context>

<pallas_src>
import functools

import jax
import jax.numpy as jnp
from jax import lax
from jax.experimental import pallas as pl
from jax.experimental.pallas import tpu as pltpu


def _round_up(x, m):
    return ((x + m - 1) // m) * m


# ----------------------------------------------------------------------------
# Kernel 1: focal + label-smoothed cross-entropy loss, tiled over batch
# ----------------------------------------------------------------------------
def _focal_ls_kernel(logits_ref, target_ref, out_ref, *, num_valid, smoothing,
                     focal_alpha, focal_gamma, w):
    t = pl.program_id(0)

    @pl.when(t == 0)
    def _():
        out_ref[...] = jnp.zeros_like(out_ref)

    logits = logits_ref[...].astype(jnp.float32)            # (TB, C)
    tgt = target_ref[...]                                    # (TB, 1) int32
    TB, C = logits.shape

    # mask for padded batch rows (if B was rounded up to the tile size)
    row_ids = lax.broadcasted_iota(jnp.int32, (TB, 1), 0) + t * TB
    valid = (row_ids < num_valid).astype(jnp.float32)        # (TB, 1)

    # one-hot target built in-kernel (replaces F.one_hot)
    class_ids = lax.broadcasted_iota(jnp.int32, (TB, C), 1)
    one_hot = (class_ids == tgt).astype(jnp.float32)         # (TB, C)

    # log-softmax directly: logp = (x - max) - log(sum(exp(x - max)))
    m = jnp.max(logits, axis=-1, keepdims=True)
    shifted = logits - m
    lse = jnp.log(jnp.sum(jnp.exp(shifted), axis=-1, keepdims=True))

    # true-class log-prob and row-sum of log-probs (no (TB,C) logp temp needed
    # beyond the single masked reduce).
    true_logp = jnp.sum(one_hot * shifted, axis=-1, keepdims=True) - lse
    sum_logp = jnp.sum(shifted, axis=-1, keepdims=True) - C * lse

    # label-smoothed CE, expanded:
    #   ce = -( (1-s)*true_logp + (s/C)*sum_logp )
    ce = -((1.0 - smoothing) * true_logp + (smoothing / C) * sum_logp)

    # focal term on the true-class probability
    true_p = jnp.exp(true_logp)
    one_minus_p = 1.0 - true_p
    g = float(focal_gamma)
    if g == 2.0:
        fw = one_minus_p * one_minus_p * focal_alpha
    elif g == int(g) and 0.0 <= g <= 4.0:
        fw = jnp.full_like(one_minus_p, focal_alpha)
        for _ in range(int(g)):
            fw = fw * one_minus_p
    else:
        fw = (one_minus_p ** focal_gamma) * focal_alpha
    focal = fw * (-true_logp)                                 # (TB, 1)

    # single weighted running sum (mean applied in the epilogue)
    partial = jnp.sum((w * focal + (1.0 - w) * ce) * valid)
    out_ref[...] += partial

    @pl.when(t == pl.num_programs(0) - 1)
    def _():
        out_ref[...] = out_ref[...] * (1.0 / num_valid)


def focal_label_smooth_ce_loss(logits, target, *, num_classes, smoothing=0.1,
                               focal_alpha=1.0, focal_gamma=2.0, w=0.5):
    B, C = logits.shape
    assert C == num_classes

    TB = min(512, _round_up(B, 8))
    B_pad = _round_up(B, TB)
    tgt2d = target.astype(jnp.int32).reshape(B, 1)
    if B_pad != B:
        logits = jnp.pad(logits, ((0, B_pad - B), (0, 0)))
        tgt2d = jnp.pad(tgt2d, ((0, B_pad - B), (0, 0)))

    kernel = functools.partial(_focal_ls_kernel, num_valid=B,
                               smoothing=smoothing, focal_alpha=focal_alpha,
                               focal_gamma=focal_gamma, w=w)
    out = pl.pallas_call(
        kernel,
        out_shape=jax.ShapeDtypeStruct((1, 1), jnp.float32),
        grid=(B_pad // TB,),
        in_specs=[
            pl.BlockSpec((TB, C), lambda t: (t, 0)),
            pl.BlockSpec((TB, 1), lambda t: (t, 0)),
        ],
        out_specs=pl.BlockSpec((1, 1), lambda t: (0, 0)),
        compiler_params=pltpu.CompilerParams(
            dimension_semantics=("arbitrary",)),
    )(logits, tgt2d)   # logits passed in native dtype; promoted in-kernel
    return out[0, 0]


# ----------------------------------------------------------------------------
# Kernel 2: fused EWC quadratic penalty  sum_p sum(fisher * (param - optpar)^2)
# ----------------------------------------------------------------------------
_LANES = 128
_ACC_ROWS = 8
_MAX_BLOCK_ROWS = 2048   # 2048 * 128 * 4B = 1 MiB per input block (f32)
_NUM_SHARDS = 2          # split across v7x's 2 TCs; serialized on v5e/v6e


def _ewc_kernel(f_ref, p_ref, o_ref, out_ref):
    j = pl.program_id(1)

    @pl.when(j == 0)
    def _():
        out_ref[...] = jnp.zeros_like(out_ref)

    d = p_ref[...] - o_ref[...]
    contrib = f_ref[...] * d * d                       # (block_rows, 128)
    # Fold block rows into the resident lane-dense (8,128) accumulator
    # (pure VPU adds; no per-step cross-lane reduction, no masked stores).
    out_ref[...] += jnp.sum(contrib.reshape(-1, _ACC_ROWS, _LANES), axis=0)


def ewc_quad_sum_fused(fisher_list, param_list, optpar_list):
    """One pallas_call over ALL parameters (flattened, concatenated)."""
    f_flat = jnp.concatenate([jnp.ravel(x).astype(jnp.float32)
                              for x in fisher_list])
    p_flat = jnp.concatenate([jnp.ravel(x).astype(jnp.float32)
                              for x in param_list])
    o_flat = jnp.concatenate([jnp.ravel(x).astype(jnp.float32)
                              for x in optpar_list])
    n = f_flat.shape[0]

    rows_needed = max(1, -(-n // _LANES))
    block_rows = min(_MAX_BLOCK_ROWS, _round_up(rows_needed, _ACC_ROWS))
    total_blocks = _round_up(-(-rows_needed // block_rows), _NUM_SHARDS)
    rows_padded = total_blocks * block_rows
    pad = rows_padded * _LANES - n
    if pad:
        # Pad only the final partial block; fisher pad is 0 -> contributes 0.
        f_flat = jnp.pad(f_flat, (0, pad))
        p_flat = jnp.pad(p_flat, (0, pad))
        o_flat = jnp.pad(o_flat, (0, pad))
    f2 = f_flat.reshape(rows_padded, _LANES)
    p2 = p_flat.reshape(rows_padded, _LANES)
    o2 = o_flat.reshape(rows_padded, _LANES)

    steps = total_blocks // _NUM_SHARDS

    def imap(s, j):
        return (s * steps + j, 0)

    out = pl.pallas_call(
        _ewc_kernel,
        out_shape=jax.ShapeDtypeStruct((_NUM_SHARDS * _ACC_ROWS, _LANES),
                                       jnp.float32),
        grid=(_NUM_SHARDS, steps),
        in_specs=[
            pl.BlockSpec((block_rows, _LANES), imap),
            pl.BlockSpec((block_rows, _LANES), imap),
            pl.BlockSpec((block_rows, _LANES), imap),
        ],
        out_specs=pl.BlockSpec((_ACC_ROWS, _LANES), lambda s, j: (s, 0)),
        compiler_params=pltpu.CompilerParams(
            dimension_semantics=("parallel", "arbitrary"),
            vmem_limit_bytes=32 * 1024 * 1024),
    )(f2, p2, o2)
    # tiny final reduce (2 * 8 * 128 elements) done in the wrapper
    return jnp.sum(out)


# ----------------------------------------------------------------------------
# Module-equivalent wrapper
# ----------------------------------------------------------------------------
class OnlineEWCWithFocalLabelSmoothLoss:
    def __init__(self, num_classes, smoothing=0.1, focal_alpha=1.0,
                 focal_gamma=2.0, ewc_lambda=0.4, decay_factor=0.9):
        self.num_classes = num_classes
        self.smoothing = smoothing
        self.focal_alpha = focal_alpha
        self.focal_gamma = focal_gamma
        self.ewc_lambda = ewc_lambda
        self.decay_factor = decay_factor
        self.fisher_dict = {}   # name -> array
        self.optpar_dict = {}   # name -> array

    def forward(self, model_params, logits, target):
        focal_ls = focal_label_smooth_ce_loss(
            logits, target, num_classes=self.num_classes,
            smoothing=self.smoothing, focal_alpha=self.focal_alpha,
            focal_gamma=self.focal_gamma, w=0.5)

        names = [n for n in model_params if n in self.fisher_dict]
        if not names:
            return focal_ls
        ewc = ewc_quad_sum_fused(
            [self.fisher_dict[n] for n in names],
            [model_params[n] for n in names],
            [self.optpar_dict[n] for n in names])
        return focal_ls + self.ewc_lambda * ewc

    # TODO(synk): update_fisher requires autograd through the external prompt
    # model (backward pass over a PLM) and has no standalone Pallas
    # equivalent; only forward() is implemented here.


# ----------------------------------------------------------------------------
# Reference (pure JAX) for sanity checking
# ----------------------------------------------------------------------------
def _reference_forward(loss_mod, model_params, logits, target):
    C = loss_mod.num_classes
    one_hot = jax.nn.one_hot(target, C, dtype=jnp.float32)
    smooth = one_hot * (1 - loss_mod.smoothing) + loss_mod.smoothing / C
    logp = jax.nn.log_softmax(logits.astype(jnp.float32), axis=-1)
    ce = jnp.mean(-jnp.sum(smooth * logp, axis=-1))
    true_logp = jnp.take_along_axis(logp, target[:, None], axis=1)[:, 0]
    true_p = jnp.exp(true_logp)
    focal = jnp.mean((1 - true_p) ** loss_mod.focal_gamma *
                     loss_mod.focal_alpha * (-true_logp))
    total = 0.5 * focal + 0.5 * ce
    ewc = 0.0
    for name, p in model_params.items():
        if name in loss_mod.fisher_dict:
            ewc = ewc + jnp.sum(loss_mod.fisher_dict[name] *
                                (p - loss_mod.optpar_dict[name]) ** 2)
    return total + loss_mod.ewc_lambda * ewc


# ----------------------------------------------------------------------------
if __name__ == "__main__":
    key = jax.random.PRNGKey(0)
    num_classes = 23          # len(classes) in the reference module
    batch = 8

    k1, k2, k3, k4, k5, k6, k7 = jax.random.split(key, 7)
    logits = jax.random.normal(k1, (batch, num_classes), dtype=jnp.float32)
    target = jax.random.randint(k2, (batch,), 0, num_classes, dtype=jnp.int32)

    # Deterministic synthetic "prompt model" parameters + stored EWC state.
    model_params = {
        "soft_prompt": jax.random.normal(k3, (16, 256), dtype=jnp.float32) * 0.02,
        "verbalizer_head": jax.random.normal(k4, (num_classes, 64),
                                             dtype=jnp.float32) * 0.05,
    }

    loss_mod = OnlineEWCWithFocalLabelSmoothLoss(num_classes=num_classes,
                                                 ewc_lambda=0.4)
    loss_mod.fisher_dict = {
        "soft_prompt": jax.random.uniform(k5, (16, 256), dtype=jnp.float32),
        "verbalizer_head": jax.random.uniform(k6, (num_classes, 64),
                                              dtype=jnp.float32),
    }
    loss_mod.optpar_dict = {
        "soft_prompt": model_params["soft_prompt"]
        + 0.01 * jax.random.normal(k7, (16, 256), dtype=jnp.float32),
        "verbalizer_head": model_params["verbalizer_head"] * 0.9,
    }

    total = loss_mod.forward(model_params, logits, target)
    total = jax.block_until_ready(total)

    ref = jax.block_until_ready(
        _reference_forward(loss_mod, model_params, logits, target))
    assert jnp.allclose(total, ref, rtol=1e-5, atol=1e-5), (total, ref)

    print("KERNEL_OK")
</pallas_src>

<mosaic_0001>
module attributes {stable_mosaic.version = 11 : i64} {
  func.func @_focal_ls_kernel(%arg0: i32, %arg1: memref<8x23xf32, #tpu.memory_space<vmem>>, %arg2: memref<8x1xi32, #tpu.memory_space<vmem>>, %arg3: memref<1x1xf32, #tpu.memory_space<vmem>>) attributes {dimension_semantics = [#tpu.dimension_semantics<arbitrary>], iteration_bounds = array<i64: 1>, scalar_prefetch = 0 : i64, scratch_operands = 0 : i64, tpu.core_type = #tpu.core_type<tc>, window_params = [{transform_indices = @transform_0, window_bounds = array<i64: 8, 23>}, {transform_indices = @transform_1, window_bounds = array<i64: 8, 1>}, {pipeline_mode = #tpu.pipeline_mode<synchronous>, transform_indices = @transform_2, window_bounds = array<i64: 1, 1>}]} {
    %c0_i32 = arith.constant 0 : i32
    %0 = arith.cmpi eq, %arg0, %c0_i32 : i32
    %1 = arith.extui %0 : i1 to i32
    %c0_i32_0 = arith.constant 0 : i32
    %2 = arith.cmpi ne, %1, %c0_i32_0 : i32
    scf.if %2 {
      %cst_24 = arith.constant 0.000000e+00 : f32
      %68 = vector.broadcast %cst_24 : f32 to vector<1x1xf32>
      %c0_25 = arith.constant 0 : index
      %c0_26 = arith.constant 0 : index
      %69 = vector.load %arg3[%c0_25, %c0_26] : memref<1x1xf32, #tpu.memory_space<vmem>>, vector<1x1xf32>
      tpu.vector_store %arg3[%c0_25, %c0_26], %68 {strides = array<i32>} : memref<1x1xf32, #tpu.memory_space<vmem>>, vector<1x1xf32>,
    } else {
    }
    %c0 = arith.constant 0 : index
    %c0_1 = arith.constant 0 : index
    %3 = vector.load %arg1[%c0, %c0_1] : memref<8x23xf32, #tpu.memory_space<vmem>>, vector<8x23xf32>
    %c0_2 = arith.constant 0 : index
    %c0_3 = arith.constant 0 : index
    %4 = vector.load %arg2[%c0_2, %c0_3] : memref<8x1xi32, #tpu.memory_space<vmem>>, vector<8x1xi32>
    %5 = tpu.iota {dimensions = array<i32: 0>} : vector<8x1xi32>
    %c8_i32 = arith.constant 8 : i32
    %6 = arith.muli %arg0, %c8_i32 : i32
    %7 = vector.broadcast %6 : i32 to vector<8x1xi32>
    %8 = arith.addi %5, %7 : vector<8x1xi32>
    %c8_i32_4 = arith.constant 8 : i32
    %9 = vector.broadcast %c8_i32_4 : i32 to vector<8x1xi32>
    %10 = arith.cmpi slt, %8, %9 : vector<8x1xi32>
    %11 = arith.extui %10 : vector<8x1xi1> to vector<8x1xi32>
    %12 = arith.sitofp %11 : vector<8x1xi32> to vector<8x1xf32>
    %13 = tpu.iota {dimensions = array<i32: 1>} : vector<8x23xi32>
    %14 = vector.broadcast %4 : vector<8x1xi32> to vector<8x23xi32>
    %15 = arith.cmpi eq, %13, %14 : vector<8x23xi32>
    %16 = arith.extui %15 : vector<8x23xi1> to vector<8x23xi32>
    %17 = arith.sitofp %16 : vector<8x23xi32> to vector<8x23xf32>
    %cst = arith.constant dense<0xFF800000> : vector<8xf32>
    %18 = vector.multi_reduction <maximumf>, %3, %cst [1] : vector<8x23xf32> to vector<8xf32>
    %19 = vector.shape_cast %18 : vector<8xf32> to vector<8x1xf32>
    %20 = vector.broadcast %19 : vector<8x1xf32> to vector<8x23xf32>
    %21 = arith.subf %3, %20 : vector<8x23xf32>
    %22 = math.exp %21 : vector<8x23xf32>
    %cst_5 = arith.constant dense<0.000000e+00> : vector<8xf32>
    %23 = vector.multi_reduction <add>, %22, %cst_5 [1] : vector<8x23xf32> to vector<8xf32>
    %24 = vector.shape_cast %23 : vector<8xf32> to vector<8x1xf32>
    %25 = math.log %24 : vector<8x1xf32>
    %26 = arith.mulf %17, %21 : vector<8x23xf32>
    %cst_6 = arith.constant dense<0.000000e+00> : vector<8xf32>
    %27 = vector.multi_reduction <add>, %26, %cst_6 [1] : vector<8x23xf32> to vector<8xf32>
    %28 = vector.shape_cast %27 : vector<8xf32> to vector<8x1xf32>
    %29 = arith.subf %28, %25 : vector<8x1xf32>
    %cst_7 = arith.constant dense<0.000000e+00> : vector<8xf32>
    %30 = vector.multi_reduction <add>, %21, %cst_7 [1] : vector<8x23xf32> to vector<8xf32>
    %31 = vector.shape_cast %30 : vector<8xf32> to vector<8x1xf32>
    %cst_8 = arith.constant 2.300000e+01 : f32
    %32 = vector.broadcast %cst_8 : f32 to vector<8x1xf32>
    %33 = arith.mulf %32, %25 : vector<8x1xf32>
    %34 = arith.subf %31, %33 : vector<8x1xf32>
    %cst_9 = arith.constant 0.899999976 : f32
    %35 = vector.broadcast %cst_9 : f32 to vector<8x1xf32>
    %36 = arith.mulf %35, %29 : vector<8x1xf32>
    %cst_10 = arith.constant 0.00434782589 : f32
    %37 = vector.broadcast %cst_10 : f32 to vector<8x1xf32>
    %38 = arith.mulf %37, %34 : vector<8x1xf32>
    %39 = arith.addf %36, %38 : vector<8x1xf32>
    %cst_11 = arith.constant 0.000000e+00 : f32
    %40 = vector.broadcast %cst_11 : f32 to vector<8x1xf32>
    %41 = arith.subf %40, %39 : vector<8x1xf32>
    %42 = math.exp %29 : vector<8x1xf32>
    %cst_12 = arith.constant 1.000000e+00 : f32
    %43 = vector.broadcast %cst_12 : f32 to vector<8x1xf32>
    %44 = arith.subf %43, %42 : vector<8x1xf32>
    %45 = arith.mulf %44, %44 : vector<8x1xf32>
    %cst_13 = arith.constant 1.000000e+00 : f32
    %46 = vector.broadcast %cst_13 : f32 to vector<8x1xf32>
    %47 = arith.mulf %45, %46 : vector<8x1xf32>
    %cst_14 = arith.constant 0.000000e+00 : f32
    %48 = vector.broadcast %cst_14 : f32 to vector<8x1xf32>
    %49 = arith.subf %48, %29 : vector<8x1xf32>
    %50 = arith.mulf %47, %49 : vector<8x1xf32>
    %cst_15 = arith.constant 5.000000e-01 : f32
    %51 = vector.broadcast %cst_15 : f32 to vector<8x1xf32>
    %52 = arith.mulf %51, %50 : vector<8x1xf32>
    %cst_16 = arith.constant 5.000000e-01 : f32
    %53 = vector.broadcast %cst_16 : f32 to vector<8x1xf32>
    %54 = arith.mulf %53, %41 : vector<8x1xf32>
    %55 = arith.addf %52, %54 : vector<8x1xf32>
    %56 = arith.mulf %55, %12 : vector<8x1xf32>
    %57 = vector.shape_cast %56 : vector<8x1xf32> to vector<1x8x1xf32>
    %cst_17 = arith.constant dense<0.000000e+00> : vector<1xf32>
    %58 = vector.multi_reduction <add>, %57, %cst_17 [1, 2] : vector<1x8x1xf32> to vector<1xf32>
    %59 = vector.shape_cast %58 : vector<1xf32> to vector<1x1x1xf32>
    %60 = vector.extract %59[0, 0, 0] : f32 from vector<1x1x1xf32>
    %c0_18 = arith.constant 0 : index
    %c0_19 = arith.constant 0 : index
    %61 = vector.load %arg3[%c0_18, %c0_19] : memref<1x1xf32, #tpu.memory_space<vmem>>, vector<1x1xf32>
    %62 = vector.broadcast %60 : f32 to vector<1x1xf32>
    %63 = arith.addf %61, %62 : vector<1x1xf32>
    %c0_20 = arith.constant 0 : index
    %c0_21 = arith.constant 0 : index
    %64 = vector.load %arg3[%c0_20, %c0_21] : memref<1x1xf32, #tpu.memory_space<vmem>>, vector<1x1xf32>
    tpu.vector_store %arg3[%c0_20, %c0_21], %63 {strides = array<i32>} : memref<1x1xf32, #tpu.memory_space<vmem>>, vector<1x1xf32>,
    %c0_i32_22 = arith.constant 0 : i32
    %65 = arith.cmpi eq, %arg0, %c0_i32_22 : i32
    %66 = arith.extui %65 : i1 to i32
    %c0_i32_23 = arith.constant 0 : i32
    %67 = arith.cmpi ne, %66, %c0_i32_23 : i32
    scf.if %67 {
      %c0_24 = arith.constant 0 : index
      %c0_25 = arith.constant 0 : index
      %68 = vector.load %arg3[%c0_24, %c0_25] : memref<1x1xf32, #tpu.memory_space<vmem>>, vector<1x1xf32>
      %cst_26 = arith.constant 1.250000e-01 : f32
      %69 = vector.broadcast %cst_26 : f32 to vector<1x1xf32>
      %70 = arith.mulf %68, %69 : vector<1x1xf32>
      %c0_27 = arith.constant 0 : index
      %c0_28 = arith.constant 0 : index
      %71 = vector.load %arg3[%c0_27, %c0_28] : memref<1x1xf32, #tpu.memory_space<vmem>>, vector<1x1xf32>
      tpu.vector_store %arg3[%c0_27, %c0_28], %70 {strides = array<i32>} : memref<1x1xf32, #tpu.memory_space<vmem>>, vector<1x1xf32>,
    } else {
    }
    return
  }
  func.func @transform_0(%arg0: i32) -> (i32, i32) {
    %c0_i32 = arith.constant 0 : i32
    %c0_i32_0 = arith.constant 0 : i32
    return %arg0, %c0_i32 : i32, i32
  }
  func.func @transform_1(%arg0: i32) -> (i32, i32) {
    %c0_i32 = arith.constant 0 : i32
    %c0_i32_0 = arith.constant 0 : i32
    return %arg0, %c0_i32 : i32, i32
  }
  func.func @transform_2(%arg0: i32) -> (i32, i32) {
    %c0_i32 = arith.constant 0 : i32
    %c0_i32_0 = arith.constant 0 : i32
    %c0_i32_1 = arith.constant 0 : i32
    return %c0_i32, %c0_i32_0 : i32, i32
  }
}

</mosaic_0001>

<bundles_post_ra>
// kernel: tpu_custom_call.1
= control target key start
LH: loop header
LB: loop body
LE: loop exit
PB: predicated region body
PF: predicated region fallthrough
CT: control target
= control target key end

     0   :  { %vm36_vm0 = vcmask 187392   ;;  %s188_s0 = inlined_call_operand.vmem [shape: f32[8,23], index: 0, kind: input, shape index: {}]   ;;  %s189_s1 = inlined_call_operand.vmem [shape: s32[8,1], index: 1, kind: input, shape index: {}]   ;;  %s190_s2 = inlined_call_operand.hbm [shape: f32[1,1], index: 2, kind: output, shape index: {}]  }
   0x1   :  { %v18_v0 = vld [vmem:[%s188_s0] sm:$0xff] }
   0x2   :  { %7 = vsyncpa [#allocation3], 0  ;;  %v37_v1 = vsel %vm36_vm0, %v18_v0, -inf  ;;  %v145_v2 = vmov 0   ;;  %v19_v3 = vld [vmem:[%s189_s1] sm:$0xff]  ;;  %vm16_vm1 = vcmask 0   ;;  %v28_v7 = vlaneseq }
   0x3   :  { %114 = vset.pattern.permute.xlu0 %v145_v2  ;;  %v146_v4 = vmov 0.0   ;;  %vm72_vm3 = vcmask 7168   ;;  %s147_s1 = smov [#allocation2]  }
   0x4   :  { %38 = vmax.xlane.f32.xlu0 %v37_v1  ;;  %17 = vst.msk [vmem:[#allocation2] sm:$0x1] %vm16_vm1, %v146_v4  ;;  %v29_v9 = vand.u32 127, %v28_v7  ;;  %s100_s13 = sshll.u32 %s147_s1, 4  ;;  %s101_s13 = int_to_ptr.vmem [resolvable:$true] %s100_s13 }
   0x5   :  { %s121_s14 = scalar_lea.vmem %s101_s13, 16  ;;  %s125_s15 = scalar_lea.vmem %s101_s13, 32 }
   0x6   :  { %p122_p0 = scmp.ne.s32.totalorder %s101_s13, %s121_s14  ;;  %p126_p1 = scmp.lt.s32.totalorder %s101_s13, %s101_s13 }
   0x7   :  { %p127_p2 = scmp.lt.s32.totalorder %s125_s15, %s121_s14 }
   0x9   :  { %p128_p3 = por %p127_p2, %p126_p1 }
   0xb   :  { %v83_v46 = vld [vmem:[#allocation2] sm:$0x1]  ;;  %p129_p4 = pnand %p128_p3, %p122_p0 }
  0x1a   :  { %31 = vperm.xlu0 %114, %v19_v3  }
  0x91   :  { %v39_v5 = vpop.xlane.xlu0 %38 }
  0x92   :  { %v40_v6 = vsub.f32 %v18_v0, %v39_v5 }
  0x94   :  { %v41_v8 = vmul.f32 1.442695, %v40_v6  ;;  %v53_v16 = vsel %vm36_vm0, %v40_v6, 0.0 }
  0x96   :  { %115 = vpow2.f32 %v41_v8 }
  0x99   :  { %v32_v10 = vpop.permute.xlu0 %31 }
  0x9a   :  { %vm33_vm2 = vcmp.eq.s32.totalorder %v29_v9, %v32_v10 }
  0x9b   :  { %v108_v11 = vsel %vm33_vm2, 1.0, %v146_v4 }
  0x9c   :  { %v48_v14 = vmul.f32 %v108_v11, %v40_v6 }
  0x9e   :  { %v49_v15 = vsel %vm36_vm0, %v48_v14, 0.0 }
  0xa0   :  { %v116_v12 = vpop.eup %115 }
  0xa1   :  { %v43_v13 = vsel %vm36_vm0, %v116_v12, 0.0 }
  0xa2   :  { %44 = vadd.xlane.f32.xlu1 %v43_v13 }
  0xa6   :  { %50 = vadd.xlane.f32.xlu1 %v49_v15 }
  0xaa   :  { %54 = vadd.xlane.f32.xlu1 %v53_v16 }
 0x12f   :  { %v45_v17 = vpop.xlane.xlu1 %44 }
 0x130   :  { %117 = vlog2.f32 %v45_v17 }
 0x133   :  { %v51_v20 = vpop.xlane.xlu1 %50 }
 0x137   :  { %v55_v24 = vpop.xlane.xlu1 %54 }
 0x13a   :  { %v118_v18 = vpop.eup %117 }
 0x13b   :  { %v47_v19 = vmul.f32 0.6931472, %v118_v18 }
 0x13d   :  { %v52_v21 = vsub.f32 %v51_v20, %v47_v19  ;;  %v56_v22 = vmul.f32 23.0, %v47_v19 }
 0x13f   :  { %v62_v23 = vmul.f32 1.442695, %v52_v21  ;;  %v57_v25 = vsub.f32 %v55_v24, %v56_v22  ;;  %v58_v27 = vmul.f32 0.9, %v52_v21  ;;  %v66_v31 = vsub.f32 0.0, %v52_v21 }
 0x141   :  { %119 = vpow2.f32 %v62_v23  ;;  %v59_v26 = vmul.f32 0.004347826, %v57_v25 }
 0x143   :  { %v60_v28 = vadd.f32 %v59_v26, %v58_v27 }
 0x145   :  { %v61_v32 = vsub.f32 0.0, %v60_v28 }
 0x147   :  { %v69_v35 = vmul.f32 0.5, %v61_v32 }
 0x14b   :  { %v120_v29 = vpop.eup %119 }
 0x14c   :  { %v64_v30 = vsub.f32 1.0, %v120_v29 }
 0x14e   :  { %v65_v33 = vmul.f32 %v64_v30, %v64_v30 }
 0x150   :  { %v67_v34 = vmul.f32 %v66_v31, %v65_v33 }
 0x152   :  { %v68_v36 = vmul.f32 0.5, %v67_v34 }
 0x154   :  { %v70_v37 = vadd.f32 %v69_v35, %v68_v36 }
 0x156   :  { %v73_v38 = vsel %vm72_vm3, %v70_v37, 0.0 }
 0x157   :  { %74 = vadd.xlane.f32.xlu1 %v73_v38 }
 0x1e4   :  { %v75_v39 = vpop.xlane.xlu1 %74 }
 0x1e5   :  { %v76_v40 = vrot.slane %v75_v39, 4 }
 0x1e7   :  { %v77_v41 = vadd.f32 %v76_v40, %v75_v39 }
 0x1e9   :  { %v78_v42 = vrot.slane %v77_v41, 2 }
 0x1eb   :  { %v79_v43 = vadd.f32 %v78_v42, %v77_v41 }
 0x1ed   :  { %v80_v44 = vrot.slane %v79_v43, 1 }
 0x1ef   :  { %v81_v45 = vadd.f32 %v80_v44, %v79_v43 }
 0x1f1   :  { %109 = vpush %v81_v45 }
 0x222   :  { %s110_s0 = spop %109 }
 0x223   :  { %v84_v47 = vstv %s110_s0 }
 0x224   :  { %v85_v48 = vadd.f32 %v84_v47, %v83_v46 }
 0x226   :  { %87 = vst.msk [vmem:[#allocation2] sm:$0x1] %vm16_vm1, %v85_v48 }
 0x22d   :  { %v91_v49 = vld [vmem:[#allocation2] sm:$0x1] }
 0x22e   :  { %v92_v50 = vmul.f32 0.125, %v91_v49 }
 0x230   :  { %93 = vst.msk [vmem:[#allocation2] sm:$0x1] %vm16_vm1, %v92_v50 }
 0x231   :  { %132 = shalt.err (!%p129_p4)
}
 0x232   :  { %s133_s18 = scalar_lea.hbm %s190_s2, 16 }
 0x233   :  { %p134_p5 = scmp.ne.s32.totalorder %s190_s2, %s133_s18  ;;  %p137_p6 = scmp.lt.u32.totalorder %s133_s18, %s190_s2 }
 0x235   :  { %p139_p7 = pnand %p137_p6, %p134_p5 }
 0x237   :  { %142 = shalt.err (!%p139_p7)
}
 0x238   :  { %103 = dma.vmem_to_hbm [thread:$0]  %s101_s13, 16, %s190_s2, [#allocation3]  }
 0x239   :  { %143 = dma.done.wait [#allocation3], 16  }
 0x23a   :  { %144 = vsyncadd [#allocation3], 4294967280 }
 0x23b   :  { %107 = vsyncpa [#allocation3], 1 }

</bundles_post_ra>
